<compile_context>
chip_gen: v5e
topology: v5e:2x2
jax: 0.10.0
libtpu: 0.0.40
codegen_flags: <defaults>
</compile_context>

<pallas_src>
import functools

import jax
import jax.numpy as jnp
from jax import lax
from jax.experimental import pallas as pl
from jax.experimental.pallas import tpu as pltpu

EPS = 1e-5
LANES = 128


def _cdiv(a, b):
    return -(-a // b)


def _round_up(a, b):
    return _cdiv(a, b) * b


def _vmem_limit_bytes():
    """Explicit scoped-VMEM limit, sized off the chip when queryable."""
    try:
        cap = int(pltpu.get_tpu_info().vmem_capacity_bytes)
    except Exception:
        cap = 64 * 1024 * 1024  # conservative: v7x physical VMEM per core
    return max(32 * 1024 * 1024, min(cap * 3 // 4, 96 * 1024 * 1024))


def _ln_rows_kernel(x_ref, w_ref, *rest, eps, has_bias):
    """Natural layout: one logical row per block row; reduce over the last dim."""
    if has_bias:
        b_ref, o_ref = rest
    else:
        (o_ref,) = rest
    x = x_ref[...].astype(jnp.float32)                  # (rt, D)
    inv_d = 1.0 / x.shape[-1]
    s1 = jnp.sum(x, axis=-1, keepdims=True)             # two independent XLU reductions
    s2 = jnp.sum(x * x, axis=-1, keepdims=True)
    mean = s1 * inv_d
    var = jnp.maximum(s2 * inv_d - mean * mean, 0.0)    # biased variance (PyTorch)
    inv = lax.rsqrt(var + eps)                          # EUP
    y = (x - mean) * inv * w_ref[...]
    if has_bias:
        y = y + b_ref[...]
    o_ref[...] = y.astype(o_ref.dtype)


def _ln_packed_kernel(x_ref, w_ref, *rest, eps, has_bias, seg, n_steps):
    """Lane-packed layout: each 128-lane row holds 128//seg logical rows of width seg.

    Segment sums are computed with a log2(seg)-step butterfly: lane l exchanges with
    lane (l XOR 2^s) via two pltpu.roll's and a select.  All loads, stores and
    elementwise ops stay fully lane-dense and the sums are exact in f32.
    """
    if has_bias:
        b_ref, o_ref = rest
    else:
        (o_ref,) = rest
    x = x_ref[...].astype(jnp.float32)                  # (rt, 128)
    lane = lax.broadcasted_iota(jnp.int32, x.shape, 1)
    s1 = x
    s2 = x * x
    for step in range(n_steps):
        d = 1 << step
        take_right = (lane & d) == 0                    # partner = lane XOR d
        s1 = s1 + jnp.where(take_right,
                            pltpu.roll(s1, LANES - d, axis=1),   # value from lane l+d
                            pltpu.roll(s1, d, axis=1))           # value from lane l-d
        s2 = s2 + jnp.where(take_right,
                            pltpu.roll(s2, LANES - d, axis=1),
                            pltpu.roll(s2, d, axis=1))
    inv_d = 1.0 / seg
    mean = s1 * inv_d                                   # per-segment mean, every lane
    var = jnp.maximum(s2 * inv_d - mean * mean, 0.0)
    inv = lax.rsqrt(var + eps)
    y = (x - mean) * inv * w_ref[...]
    if has_bias:
        y = y + b_ref[...]
    o_ref[...] = y.astype(o_ref.dtype)


def layer_norm(x, weight, bias=None, *, eps=EPS, row_tile=None):
    """LayerNorm over the last dim of x (PyTorch F.layer_norm semantics)."""
    orig_shape = x.shape
    D = int(orig_shape[-1])
    out_dtype = x.dtype
    itemsize = jnp.dtype(out_dtype).itemsize

    x2 = x.reshape(-1, D)
    R = x2.shape[0]

    has_bias = bias is not None
    w_f32 = weight.astype(jnp.float32).reshape(D)
    b_f32 = bias.astype(jnp.float32).reshape(D) if has_bias else None

    # Lane packing for small power-of-two D (keeps DMA and vld/vst lane-dense).
    packed = (D < LANES) and (LANES % D == 0)
    P = LANES // D if packed else 1
    W = LANES if packed else D            # last dim of the kernel block
    # TODO(synk): D that is neither a multiple of 128 nor a power-of-two divisor of
    # 128 falls back to the natural (masked-lane) layout; pad D at the model level
    # if that case matters for throughput.

    min_rows = 8 if itemsize >= 4 else (16 if itemsize == 2 else 32)

    n_rows = _cdiv(max(R, 1), P)                        # kernel rows needed
    rows_needed = _round_up(n_rows, min_rows)

    vmem_limit = _vmem_limit_bytes()
    if row_tile is None:
        # Per kernel-row: double-buffered input+output plus ~10 f32 temps/element.
        bytes_per_row = W * (4 * itemsize + 10 * 4)
        rt = (max(vmem_limit // 2, 1 << 20) // bytes_per_row) // min_rows * min_rows
        rt = max(min_rows, min(rt, 1024))
    else:
        rt = _round_up(max(int(row_tile), min_rows), min_rows)
    rt = min(rt, rows_needed)
    # Keep at least two grid steps when there is enough work (v7x: two TensorCores
    # share the "parallel" grid axis).
    if rows_needed >= 2 * min_rows and rows_needed <= rt:
        rt = _round_up(_cdiv(rows_needed, 2), min_rows)

    n_tiles = _cdiv(rows_needed, rt)
    rows_padded = n_tiles * rt                          # padded kernel-row count
    R_padded = rows_padded * P                          # padded logical-row count

    if R_padded != R:
        x2 = jnp.pad(x2, ((0, R_padded - R), (0, 0)))   # zero rows normalize safely
    xk = x2.reshape(rows_padded, W) if packed else x2

    if packed:
        w_k = jnp.tile(w_f32, P).reshape(1, W)
        b_k = jnp.tile(b_f32, P).reshape(1, W) if has_bias else None
        kernel = functools.partial(_ln_packed_kernel, eps=float(eps),
                                   has_bias=has_bias, seg=D,
                                   n_steps=D.bit_length() - 1)
    else:
        w_k = w_f32.reshape(1, W)
        b_k = b_f32.reshape(1, W) if has_bias else None
        kernel = functools.partial(_ln_rows_kernel, eps=float(eps),
                                   has_bias=has_bias)

    in_specs = [
        pl.BlockSpec((rt, W), lambda i: (i, 0)),
        pl.BlockSpec((1, W), lambda i: (0, 0)),
    ]
    inputs = [xk, w_k]
    if has_bias:
        in_specs.append(pl.BlockSpec((1, W), lambda i: (0, 0)))
        inputs.append(b_k)

    cost = pl.CostEstimate(
        flops=10 * rows_padded * W,
        transcendentals=rows_padded * W,
        bytes_accessed=2 * rows_padded * W * itemsize + (2 if has_bias else 1) * W * 4,
    )

    out = pl.pallas_call(
        kernel,
        out_shape=jax.ShapeDtypeStruct((rows_padded, W), out_dtype),
        grid_spec=pltpu.PrefetchScalarGridSpec(
            num_scalar_prefetch=0,
            grid=(n_tiles,),
            in_specs=in_specs,
            out_specs=pl.BlockSpec((rt, W), lambda i: (i, 0)),
        ),
        compiler_params=pltpu.CompilerParams(
            dimension_semantics=("parallel",),
            vmem_limit_bytes=vmem_limit,
        ),
        cost_estimate=cost,
    )(*inputs)

    out = out.reshape(R_padded, D)
    if R_padded != R:
        out = out[:R]
    return out.reshape(orig_shape)


def _layer_norm_reference(x, weight, bias):
    xf = x.astype(jnp.float32)
    mean = jnp.mean(xf, axis=-1, keepdims=True)
    var = jnp.mean((xf - mean) ** 2, axis=-1, keepdims=True)
    y = (xf - mean) * lax.rsqrt(var + EPS) * weight.astype(jnp.float32)
    if bias is not None:
        y = y + bias.astype(jnp.float32)
    return y.astype(x.dtype)


if __name__ == "__main__":
    key = jax.random.PRNGKey(0)
    k1, k2, k3, k4, k5 = jax.random.split(key, 5)

    # Case 1: transformer-style (B, T, D) with D=32 (< 128 -> lane-packed path), bias=True.
    B, T, D = 2, 8, 32
    x = jax.random.normal(k1, (B, T, D), dtype=jnp.float32)
    weight = 1.0 + 0.05 * jax.random.normal(k2, (D,), dtype=jnp.float32)
    bias = 0.05 * jax.random.normal(k3, (D,), dtype=jnp.float32)

    y = jax.block_until_ready(layer_norm(x, weight, bias))
    ref = _layer_norm_reference(x, weight, bias)
    assert y.shape == x.shape and y.dtype == x.dtype
    assert jnp.allclose(y, ref, atol=1e-4, rtol=1e-4), "packed-path mismatch vs reference"

    # Case 2: D a multiple of 128 (natural lane-dense path), odd row count
    # (exercises row padding) and bias=None (LayerNorm(..., bias=False)).
    B2, T2, D2 = 3, 5, 256
    x2 = jax.random.normal(k4, (B2, T2, D2), dtype=jnp.float32)
    w2 = 1.0 + 0.05 * jax.random.normal(k5, (D2,), dtype=jnp.float32)

    y2 = jax.block_until_ready(layer_norm(x2, w2, None))
    ref2 = _layer_norm_reference(x2, w2, None)
    assert y2.shape == x2.shape and y2.dtype == x2.dtype
    assert jnp.allclose(y2, ref2, atol=1e-4, rtol=1e-4), "natural-path mismatch vs reference"

    print("KERNEL_OK")
</pallas_src>

<mosaic_0001>
module attributes {stable_mosaic.version = 11 : i64} {
  func.func @_ln_packed_kernel(%arg0: i32, %arg1: memref<8x128xf32, #tpu.memory_space<vmem>>, %arg2: memref<1x128xf32, #tpu.memory_space<vmem>>, %arg3: memref<1x128xf32, #tpu.memory_space<vmem>>, %arg4: memref<8x128xf32, #tpu.memory_space<vmem>>) attributes {dimension_semantics = [#tpu.dimension_semantics<parallel>], iteration_bounds = array<i64: 1>, scalar_prefetch = 0 : i64, scratch_operands = 0 : i64, tpu.core_type = #tpu.core_type<tc>, window_params = [{transform_indices = @transform_0, window_bounds = array<i64: 8, 128>}, {pipeline_mode = #tpu.pipeline_mode<synchronous>, transform_indices = @transform_1, window_bounds = array<i64: 1, 128>}, {pipeline_mode = #tpu.pipeline_mode<synchronous>, transform_indices = @transform_2, window_bounds = array<i64: 1, 128>}, {transform_indices = @transform_3, window_bounds = array<i64: 8, 128>}]} {
    %c0 = arith.constant 0 : index
    %c0_0 = arith.constant 0 : index
    %0 = vector.load %arg1[%c0, %c0_0] : memref<8x128xf32, #tpu.memory_space<vmem>>, vector<8x128xf32>
    %1 = tpu.iota {dimensions = array<i32: 1>} : vector<8x128xi32>
    %2 = arith.mulf %0, %0 : vector<8x128xf32>
    %c1_i32 = arith.constant 1 : i32
    %3 = vector.broadcast %c1_i32 : i32 to vector<8x128xi32>
    %4 = arith.andi %1, %3 : vector<8x128xi32>
    %c0_i32 = arith.constant 0 : i32
    %5 = vector.broadcast %c0_i32 : i32 to vector<8x128xi32>
    %6 = arith.cmpi eq, %4, %5 : vector<8x128xi32>
    %c127_i32 = arith.constant 127 : i32
    %7 = tpu.dynamic_rotate %0 by %c127_i32 dim 1 : vector<8x128xf32>, i32 -> vector<8x128xf32>
    %c1_i32_1 = arith.constant 1 : i32
    %8 = tpu.dynamic_rotate %0 by %c1_i32_1 dim 1 : vector<8x128xf32>, i32 -> vector<8x128xf32>
    %9 = arith.select %6, %7, %8 : vector<8x128xi1>, vector<8x128xf32>
    %10 = arith.addf %0, %9 : vector<8x128xf32>
    %c127_i32_2 = arith.constant 127 : i32
    %11 = tpu.dynamic_rotate %2 by %c127_i32_2 dim 1 : vector<8x128xf32>, i32 -> vector<8x128xf32>
    %c1_i32_3 = arith.constant 1 : i32
    %12 = tpu.dynamic_rotate %2 by %c1_i32_3 dim 1 : vector<8x128xf32>, i32 -> vector<8x128xf32>
    %13 = arith.select %6, %11, %12 : vector<8x128xi1>, vector<8x128xf32>
    %14 = arith.addf %2, %13 : vector<8x128xf32>
    %c2_i32 = arith.constant 2 : i32
    %15 = vector.broadcast %c2_i32 : i32 to vector<8x128xi32>
    %16 = arith.andi %1, %15 : vector<8x128xi32>
    %c0_i32_4 = arith.constant 0 : i32
    %17 = vector.broadcast %c0_i32_4 : i32 to vector<8x128xi32>
    %18 = arith.cmpi eq, %16, %17 : vector<8x128xi32>
    %c126_i32 = arith.constant 126 : i32
    %19 = tpu.dynamic_rotate %10 by %c126_i32 dim 1 : vector<8x128xf32>, i32 -> vector<8x128xf32>
    %c2_i32_5 = arith.constant 2 : i32
    %20 = tpu.dynamic_rotate %10 by %c2_i32_5 dim 1 : vector<8x128xf32>, i32 -> vector<8x128xf32>
    %21 = arith.select %18, %19, %20 : vector<8x128xi1>, vector<8x128xf32>
    %22 = arith.addf %10, %21 : vector<8x128xf32>
    %c126_i32_6 = arith.constant 126 : i32
    %23 = tpu.dynamic_rotate %14 by %c126_i32_6 dim 1 : vector<8x128xf32>, i32 -> vector<8x128xf32>
    %c2_i32_7 = arith.constant 2 : i32
    %24 = tpu.dynamic_rotate %14 by %c2_i32_7 dim 1 : vector<8x128xf32>, i32 -> vector<8x128xf32>
    %25 = arith.select %18, %23, %24 : vector<8x128xi1>, vector<8x128xf32>
    %26 = arith.addf %14, %25 : vector<8x128xf32>
    %c4_i32 = arith.constant 4 : i32
    %27 = vector.broadcast %c4_i32 : i32 to vector<8x128xi32>
    %28 = arith.andi %1, %27 : vector<8x128xi32>
    %c0_i32_8 = arith.constant 0 : i32
    %29 = vector.broadcast %c0_i32_8 : i32 to vector<8x128xi32>
    %30 = arith.cmpi eq, %28, %29 : vector<8x128xi32>
    %c124_i32 = arith.constant 124 : i32
    %31 = tpu.dynamic_rotate %22 by %c124_i32 dim 1 : vector<8x128xf32>, i32 -> vector<8x128xf32>
    %c4_i32_9 = arith.constant 4 : i32
    %32 = tpu.dynamic_rotate %22 by %c4_i32_9 dim 1 : vector<8x128xf32>, i32 -> vector<8x128xf32>
    %33 = arith.select %30, %31, %32 : vector<8x128xi1>, vector<8x128xf32>
    %34 = arith.addf %22, %33 : vector<8x128xf32>
    %c124_i32_10 = arith.constant 124 : i32
    %35 = tpu.dynamic_rotate %26 by %c124_i32_10 dim 1 : vector<8x128xf32>, i32 -> vector<8x128xf32>
    %c4_i32_11 = arith.constant 4 : i32
    %36 = tpu.dynamic_rotate %26 by %c4_i32_11 dim 1 : vector<8x128xf32>, i32 -> vector<8x128xf32>
    %37 = arith.select %30, %35, %36 : vector<8x128xi1>, vector<8x128xf32>
    %38 = arith.addf %26, %37 : vector<8x128xf32>
    %c8_i32 = arith.constant 8 : i32
    %39 = vector.broadcast %c8_i32 : i32 to vector<8x128xi32>
    %40 = arith.andi %1, %39 : vector<8x128xi32>
    %c0_i32_12 = arith.constant 0 : i32
    %41 = vector.broadcast %c0_i32_12 : i32 to vector<8x128xi32>
    %42 = arith.cmpi eq, %40, %41 : vector<8x128xi32>
    %c120_i32 = arith.constant 120 : i32
    %43 = tpu.dynamic_rotate %34 by %c120_i32 dim 1 : vector<8x128xf32>, i32 -> vector<8x128xf32>
    %c8_i32_13 = arith.constant 8 : i32
    %44 = tpu.dynamic_rotate %34 by %c8_i32_13 dim 1 : vector<8x128xf32>, i32 -> vector<8x128xf32>
    %45 = arith.select %42, %43, %44 : vector<8x128xi1>, vector<8x128xf32>
    %46 = arith.addf %34, %45 : vector<8x128xf32>
    %c120_i32_14 = arith.constant 120 : i32
    %47 = tpu.dynamic_rotate %38 by %c120_i32_14 dim 1 : vector<8x128xf32>, i32 -> vector<8x128xf32>
    %c8_i32_15 = arith.constant 8 : i32
    %48 = tpu.dynamic_rotate %38 by %c8_i32_15 dim 1 : vector<8x128xf32>, i32 -> vector<8x128xf32>
    %49 = arith.select %42, %47, %48 : vector<8x128xi1>, vector<8x128xf32>
    %50 = arith.addf %38, %49 : vector<8x128xf32>
    %c16_i32 = arith.constant 16 : i32
    %51 = vector.broadcast %c16_i32 : i32 to vector<8x128xi32>
    %52 = arith.andi %1, %51 : vector<8x128xi32>
    %c0_i32_16 = arith.constant 0 : i32
    %53 = vector.broadcast %c0_i32_16 : i32 to vector<8x128xi32>
    %54 = arith.cmpi eq, %52, %53 : vector<8x128xi32>
    %c112_i32 = arith.constant 112 : i32
    %55 = tpu.dynamic_rotate %46 by %c112_i32 dim 1 : vector<8x128xf32>, i32 -> vector<8x128xf32>
    %c16_i32_17 = arith.constant 16 : i32
    %56 = tpu.dynamic_rotate %46 by %c16_i32_17 dim 1 : vector<8x128xf32>, i32 -> vector<8x128xf32>
    %57 = arith.select %54, %55, %56 : vector<8x128xi1>, vector<8x128xf32>
    %58 = arith.addf %46, %57 : vector<8x128xf32>
    %c112_i32_18 = arith.constant 112 : i32
    %59 = tpu.dynamic_rotate %50 by %c112_i32_18 dim 1 : vector<8x128xf32>, i32 -> vector<8x128xf32>
    %c16_i32_19 = arith.constant 16 : i32
    %60 = tpu.dynamic_rotate %50 by %c16_i32_19 dim 1 : vector<8x128xf32>, i32 -> vector<8x128xf32>
    %61 = arith.select %54, %59, %60 : vector<8x128xi1>, vector<8x128xf32>
    %62 = arith.addf %50, %61 : vector<8x128xf32>
    %cst = arith.constant 3.125000e-02 : f32
    %63 = vector.broadcast %cst : f32 to vector<8x128xf32>
    %64 = arith.mulf %58, %63 : vector<8x128xf32>
    %cst_20 = arith.constant 3.125000e-02 : f32
    %65 = vector.broadcast %cst_20 : f32 to vector<8x128xf32>
    %66 = arith.mulf %62, %65 : vector<8x128xf32>
    %67 = arith.mulf %64, %64 : vector<8x128xf32>
    %68 = arith.subf %66, %67 : vector<8x128xf32>
    %cst_21 = arith.constant 0.000000e+00 : f32
    %69 = vector.broadcast %cst_21 : f32 to vector<8x128xf32>
    %70 = arith.maximumf %68, %69 : vector<8x128xf32>
    %cst_22 = arith.constant 9.99999974E-6 : f32
    %71 = vector.broadcast %cst_22 : f32 to vector<8x128xf32>
    %72 = arith.addf %70, %71 : vector<8x128xf32>
    %73 = math.rsqrt %72 : vector<8x128xf32>
    %74 = arith.subf %0, %64 : vector<8x128xf32>
    %75 = arith.mulf %74, %73 : vector<8x128xf32>
    %c0_23 = arith.constant 0 : index
    %c0_24 = arith.constant 0 : index
    %76 = vector.load %arg2[%c0_23, %c0_24] : memref<1x128xf32, #tpu.memory_space<vmem>>, vector<1x128xf32>
    %77 = vector.broadcast %76 : vector<1x128xf32> to vector<8x128xf32>
    %78 = arith.mulf %75, %77 : vector<8x128xf32>
    %c0_25 = arith.constant 0 : index
    %c0_26 = arith.constant 0 : index
    %79 = vector.load %arg3[%c0_25, %c0_26] : memref<1x128xf32, #tpu.memory_space<vmem>>, vector<1x128xf32>
    %80 = vector.broadcast %79 : vector<1x128xf32> to vector<8x128xf32>
    %81 = arith.addf %78, %80 : vector<8x128xf32>
    %c0_27 = arith.constant 0 : index
    %c0_28 = arith.constant 0 : index
    %82 = vector.load %arg4[%c0_27, %c0_28] : memref<8x128xf32, #tpu.memory_space<vmem>>, vector<8x128xf32>
    tpu.vector_store %arg4[%c0_27, %c0_28], %81 {strides = array<i32>} : memref<8x128xf32, #tpu.memory_space<vmem>>, vector<8x128xf32>,
    return
  }
  func.func @transform_0(%arg0: i32) -> (i32, i32) {
    %c0_i32 = arith.constant 0 : i32
    %c0_i32_0 = arith.constant 0 : i32
    return %arg0, %c0_i32 : i32, i32
  }
  func.func @transform_1(%arg0: i32) -> (i32, i32) {
    %c0_i32 = arith.constant 0 : i32
    %c0_i32_0 = arith.constant 0 : i32
    %c0_i32_1 = arith.constant 0 : i32
    return %c0_i32, %c0_i32_0 : i32, i32
  }
  func.func @transform_2(%arg0: i32) -> (i32, i32) {
    %c0_i32 = arith.constant 0 : i32
    %c0_i32_0 = arith.constant 0 : i32
    %c0_i32_1 = arith.constant 0 : i32
    return %c0_i32, %c0_i32_0 : i32, i32
  }
  func.func @transform_3(%arg0: i32) -> (i32, i32) {
    %c0_i32 = arith.constant 0 : i32
    %c0_i32_0 = arith.constant 0 : i32
    return %arg0, %c0_i32 : i32, i32
  }
}

</mosaic_0001>

<bundles_post_ra>
// kernel: tpu_custom_call.1
= control target key start
LH: loop header
LB: loop body
LE: loop exit
PB: predicated region body
PF: predicated region fallthrough
CT: control target
= control target key end

     0   :  { %8 = vsyncpa [#allocation3], 0  ;;  %s319_s0 = inlined_call_operand.hbm [shape: f32[8,128], index: 0, kind: input, shape index: {}]   ;;  %s320_s1 = inlined_call_operand.hbm [shape: f32[1,128], index: 1, kind: input, shape index: {}]   ;;  %s321_s2 = inlined_call_operand.vmem [shape: f32[1,128], index: 2, kind: input, shape index: {}]   ;;  %s322_s3 = inlined_call_operand.hbm [shape: f32[8,128], index: 3, kind: output, shape index: {}]  }
   0x1   :  { %9 = vsyncpa [#allocation6], 0 }
   0x2   :  { %10 = vsyncpa [#allocation4], 0  ;;  %s16_s14 = sshll.u32 %s319_s0, 4  ;;  %s259_s15 = smov [#allocation2]   ;;  %s17_s14 = int_to_ptr.hbm [resolvable:$true] %s16_s14 }
   0x3   :  { %s18_s16 = sshll.u32 %s259_s15, 4  ;;  %s27_s19 = sshll.u32 %s320_s1, 4  ;;  %s19_s16 = int_to_ptr.vmem [resolvable:$true] %s18_s16  ;;  %s28_s19 = int_to_ptr.hbm [resolvable:$true] %s27_s19 }
   0x4   :  { %21 = dma.hbm_to_vmem [thread:$0]  %s17_s14, 128, %s19_s16, [#allocation3]  }
   0x5   :  { %s260_s20 = smov [#allocation5]  }
   0x6   :  { %s29_s21 = sshll.u32 %s260_s20, 4  ;;  %s30_s21 = int_to_ptr.vmem [resolvable:$true] %s29_s21 }
   0x7   :  { %32 = dma.hbm_to_vmem [thread:$0]  %s28_s19, 16, %s30_s21, [#allocation6]  }
   0x8   :  { %253 = dma.done.wait [#allocation3], 128  }
   0x9   :  { %254 = vsyncadd [#allocation3], 4294967168 }
   0xa   :  { %255 = dma.done.wait [#allocation6], 16  }
   0xb   :  { %256 = vsyncadd [#allocation6], 4294967280  ;;  %v298_v0 = vld [vmem:[#allocation2] sm:$0xff]  ;;  %s261_s0 = smov 127   ;;  %s262_s1 = smov 1   ;;  %v44_v2 = vlaneseq }
   0xc   :  { %49 = vrot.lane.b32.xlu0 %v298_v0, %s261_s0  ;;  %v46_v1 = vmul.f32 %v298_v0, %v298_v0  ;;  %s263_s22 = smov 126   ;;  %s264_s23 = smov 2   ;;  %v177_v62 = vld [vmem:[#allocation5] ss:$0 sm:$0xff] }
   0xd   :  { %v304_v3 = vand.u32 127, %v44_v2  ;;  %s265_s24 = smov 124   ;;  %s266_s25 = smov 4   ;;  %v178_v2 = vld [vmem:[%s321_s2] ss:$0 sm:$0xff] }
   0xe   :  { %55 = vrot.lane.b32.xlu1 %v46_v1, %s261_s0  ;;  %s267_s26 = smov 8   ;;  %s268_s27 = smov 120  }
   0xf   :  { %v47_v6 = vand.u32 1, %v304_v3  ;;  %v61_v14 = vand.u32 2, %v304_v3  ;;  %v75_v22 = vand.u32 4, %v304_v3  ;;  %v89_v31 = vand.u32 8, %v304_v3  ;;  %s269_s28 = smov 16   ;;  %s270_s29 = smov 112  }
  0x10   :  { %v103_v40 = vand.u32 16, %v304_v3  ;;  %s271_s5 = smov [#allocation7]   ;;  %s153_s9 = sshll.u32 %s322_s3, 4  ;;  %s154_s9 = int_to_ptr.hbm [resolvable:$true] %s153_s9 }
  0x11   :  { %vm48_vm0 = vcmp.eq.s32.totalorder %v47_v6, 0  ;;  %vm62_vm1 = vcmp.eq.s32.totalorder %v61_v14, 0  ;;  %vm76_vm2 = vcmp.eq.s32.totalorder %v75_v22, 0  ;;  %vm90_vm3 = vcmp.eq.s32.totalorder %v89_v31, 0  ;;  %s151_s6 = sshll.u32 %s271_s5, 4  ;;  %s152_s6 = int_to_ptr.vmem [resolvable:$true] %s151_s6 }
  0x12   :  { %vm104_vm4 = vcmp.eq.s32.totalorder %v103_v40, 0 }
  0x14   :  { %51 = vrot.lane.b32.xlu0 %v298_v0, %s262_s1 }
  0x16   :  { %57 = vrot.lane.b32.xlu1 %v46_v1, %s262_s1 }
  0x7e   :  { %v50_v4 = vpop.permute.xlu0 %49 }
  0x80   :  { %v56_v5 = vpop.permute.xlu1 %55 }
  0x86   :  { %v52_v7 = vpop.permute.xlu0 %51 }
  0x87   :  { %v53_v8 = vsel %vm48_vm0, %v50_v4, %v52_v7 }
  0x88   :  { %v54_v9 = vadd.f32 %v53_v8, %v298_v0  ;;  %v58_v10 = vpop.permute.xlu1 %57 }
  0x89   :  { %v59_v11 = vsel %vm48_vm0, %v56_v5, %v58_v10 }
  0x8a   :  { %v60_v12 = vadd.f32 %v59_v11, %v46_v1  ;;  %63 = vrot.lane.b32.xlu2 %v54_v9, %s263_s22 }
  0x8c   :  { %71 = vrot.lane.b32.xlu1 %v60_v12, %s264_s23  ;;  %69 = vrot.lane.b32.xlu0 %v60_v12, %s263_s22 }
  0x92   :  { %65 = vrot.lane.b32.xlu2 %v54_v9, %s264_s23 }
  0xe4   :  { %v64_v13 = vpop.permute.xlu2 %63 }
  0xec   :  { %v66_v15 = vpop.permute.xlu2 %65 }
  0xed   :  { %v67_v16 = vsel %vm62_vm1, %v64_v13, %v66_v15 }
  0xee   :  { %v68_v17 = vadd.f32 %v67_v16, %v54_v9 }
  0xf0   :  { %77 = vrot.lane.b32.xlu2 %v68_v17, %s265_s24  ;;  %79 = vrot.lane.b32.xlu0 %v68_v17, %s266_s25 }
  0xfe   :  { %v72_v18 = vpop.permute.xlu1 %71  ;;  %v70_v19 = vpop.permute.xlu0 %69 }
  0xff   :  { %v73_v20 = vsel %vm62_vm1, %v70_v19, %v72_v18 }
 0x100   :  { %v74_v21 = vadd.f32 %v73_v20, %v60_v12 }
 0x102   :  { %85 = vrot.lane.b32.xlu2 %v74_v21, %s266_s25  ;;  %83 = vrot.lane.b32.xlu1 %v74_v21, %s265_s24 }
 0x14a   :  { %v78_v23 = vpop.permute.xlu2 %77 }
 0x15c   :  { %v86_v27 = vpop.permute.xlu2 %85 }
 0x162   :  { %v80_v24 = vpop.permute.xlu0 %79 }
 0x163   :  { %v81_v25 = vsel %vm76_vm2, %v78_v23, %v80_v24 }
 0x164   :  { %v82_v26 = vadd.f32 %v81_v25, %v68_v17 }
 0x166   :  { %93 = vrot.lane.b32.xlu1 %v82_v26, %s267_s26  ;;  %91 = vrot.lane.b32.xlu0 %v82_v26, %s268_s27 }
 0x174   :  { %v84_v28 = vpop.permute.xlu1 %83 }
 0x175   :  { %v87_v29 = vsel %vm76_vm2, %v84_v28, %v86_v27 }
 0x176   :  { %v88_v30 = vadd.f32 %v87_v29, %v74_v21 }
 0x178   :  { %97 = vrot.lane.b32.xlu2 %v88_v30, %s268_s27  ;;  %99 = vrot.lane.b32.xlu0 %v88_v30, %s267_s26 }
 0x1d2   :  { %v98_v36 = vpop.permute.xlu2 %97 }
 0x1d8   :  { %v94_v32 = vpop.permute.xlu1 %93  ;;  %v92_v33 = vpop.permute.xlu0 %91 }
 0x1d9   :  { %v95_v34 = vsel %vm90_vm3, %v92_v33, %v94_v32 }
 0x1da   :  { %v96_v35 = vadd.f32 %v95_v34, %v82_v26 }
 0x1dc   :  { %107 = vrot.lane.b32.xlu2 %v96_v35, %s269_s28  ;;  %105 = vrot.lane.b32.xlu1 %v96_v35, %s270_s29 }
 0x1ea   :  { %v100_v37 = vpop.permute.xlu0 %99 }
 0x1eb   :  { %v101_v38 = vsel %vm90_vm3, %v98_v36, %v100_v37 }
 0x1ec   :  { %v102_v39 = vadd.f32 %v101_v38, %v88_v30 }
 0x1ee   :  { %113 = vrot.lane.b32.xlu1 %v102_v39, %s269_s28  ;;  %111 = vrot.lane.b32.xlu0 %v102_v39, %s270_s29 }
 0x236   :  { %v108_v42 = vpop.permute.xlu2 %107 }
 0x24e   :  { %v106_v41 = vpop.permute.xlu1 %105 }
 0x24f   :  { %v109_v43 = vsel %vm104_vm4, %v106_v41, %v108_v42 }
 0x250   :  { %v110_v44 = vadd.f32 %v109_v43, %v96_v35 }
 0x252   :  { %v117_v45 = vmul.f32 0.03125, %v110_v44 }
 0x254   :  { %v119_v50 = vmul.f32 %v117_v45, %v117_v45  ;;  %v133_v61 = vsub.f32 %v298_v0, %v117_v45 }
 0x260   :  { %v114_v46 = vpop.permute.xlu1 %113  ;;  %v112_v47 = vpop.permute.xlu0 %111 }
 0x261   :  { %v115_v48 = vsel %vm104_vm4, %v112_v47, %v114_v46 }
 0x262   :  { %v116_v49 = vadd.f32 %v115_v48, %v102_v39 }
 0x264   :  { %v118_v51 = vmul.f32 0.03125, %v116_v49 }
 0x266   :  { %v120_v52 = vsub.f32 %v118_v51, %v119_v50 }
 0x268   :  { %v121_v53 = vmax.f32 %v120_v52, 0.0 }
 0x26a   :  { %v122_v54 = vadd.f32 1e-05, %v121_v53 }
 0x26c   :  { %179 = vrsqrt.f32 %v122_v54  ;;  %vm129_vm6 = vweird.f32 %v122_v54 }
 0x272   :  { %v180_v55 = vpop.eup %179 }
 0x273   :  { %v124_v56 = vmul.f32 %v180_v55, %v122_v54  ;;  %vm130_vm5 = vweird.f32 %v180_v55 }
 0x274   :  { %vm131_vm7 = vmor %vm129_vm6, %vm130_vm5 }
 0x275   :  { %v125_v57 = vmul.f32 %v180_v55, %v124_v56 }
 0x277   :  { %v126_v58 = vmul.f32 0.5, %v125_v57 }
 0x279   :  { %v127_v59 = vsub.f32 1.5, %v126_v58 }
 0x27b   :  { %v128_v60 = vmul.f32 %v180_v55, %v127_v59 }
 0x27d   :  { %v132_v63 = vsel %vm131_vm7, %v180_v55, %v128_v60 }
 0x27e   :  { %v134_v1 = vmul.f32 %v133_v61, %v132_v63 }
 0x280   :  { %v139_v3 = vmul.f32 %v177_v62, %v134_v1 }
 0x282   :  { %v144_v4 = vadd.f32 %v178_v2, %v139_v3 }
 0x284   :  { %145 = vst [vmem:[#allocation7] sm:$0xff] %v144_v4 }
 0x285   :  { %156 = dma.vmem_to_hbm [thread:$0]  %s152_s6, 128, %s154_s9, [#allocation4]  }
 0x286   :  { %257 = dma.done.wait [#allocation4], 128  }
 0x287   :  { %258 = vsyncadd [#allocation4], 4294967168 }
 0x288   :  { %161 = vsyncpa [#allocation3], 1 }
 0x289   :  { %162 = vsyncpa [#allocation6], 1 }
 0x28a   :  { %163 = vsyncpa [#allocation4], 1 }

</bundles_post_ra>
